<compile_context>
chip_gen: v5e
topology: v5e:2x2
jax: 0.10.0
libtpu: 0.0.40
codegen_flags: <defaults>
</compile_context>

<pallas_src>
import functools

import jax
import jax.numpy as jnp
from jax.experimental import pallas as pl
from jax.experimental.pallas import tpu as pltpu


def _sum11(x):
    # full (TR, 128) reduction kept as a (1, 1) value (lane reduce, then sublane reduce)
    return jnp.sum(jnp.sum(x, axis=1, keepdims=True), axis=0, keepdims=True)


def _recip(x):
    # EUP approximate reciprocal + one Newton-Raphson step (~f32 accuracy) so the
    # divide never lands on the saturated VALU path.
    r = pl.reciprocal(x, approx=True)
    return r * (2.0 - x * r)


def _lovasz_kernel(tot_ref, cum0_ref, err_ref, gt_ref, tri_ref, lo_ref, out_ref, *,
                   beta, sym, p_real, tile_rows, tile_elems):
    """One (tile_rows, 128) lane-dense tile of the sorted error/label stream.

    tot_ref : SMEM (B_eff,)            int32 -- per-sample label sum (scalar prefetch)
    cum0_ref: SMEM (B_eff * n_tiles,)  int32 -- exclusive per-tile label prefix (scalar prefetch)
    err_ref : VMEM (1, TR, 128) f32   -- hinge errors, sorted descending
    gt_ref  : VMEM (1, TR, 128) bf16  -- labels permuted by the same sort (exact 0/1)
    tri_ref : VMEM (128, 128)  bf16   -- tri[j, i] = (j <= i): in-row inclusive cumsum
    lo_ref  : VMEM (TR, TR)    bf16   -- lo[r, s]  = (s <  r): exclusive row prefix
    out_ref : VMEM (1, 8, 128) f32    -- per-(sample, tile) partial loss (broadcast)
    """
    b = pl.program_id(0)
    t = pl.program_id(1)
    n_tiles = pl.num_programs(1)

    err = err_ref[0]                                  # (TR, 128) f32
    gt_b = gt_ref[0]                                  # (TR, 128) bf16
    gt = gt_b.astype(jnp.float32)

    # ---- global inclusive prefix sum of gt at every element (MXU) ----
    row_inc = jnp.dot(gt_b, tri_ref[...],
                      preferred_element_type=jnp.float32)           # (TR, 128)
    row_tot = row_inc[:, 127:128].astype(jnp.bfloat16)              # (TR, 1), reuse MXU result
    row_carry = jnp.dot(lo_ref[...],
                        jnp.broadcast_to(row_tot, (tile_rows, 128)),
                        preferred_element_type=jnp.float32)         # (TR, 128)
    prev = cum0_ref[b * n_tiles + t].astype(jnp.float32)            # tile-start carry (scalar)
    cum = row_inc + row_carry + prev

    # ---- 1-based global position & validity mask ----
    sub_i = jax.lax.broadcasted_iota(jnp.int32, (tile_rows, 128), 0)
    lane_i = jax.lax.broadcasted_iota(jnp.int32, (tile_rows, 128), 1)
    pos_i = t * tile_elems + sub_i * 128 + lane_i + 1
    pos = pos_i.astype(jnp.float32)
    valid = pos_i <= p_real

    total = tot_ref[b].astype(jnp.float32)
    # F.elu(x) + 1  ==  x + 1 (x > 0) else exp(x)   (exp runs on the EUP slot)
    w = jnp.where(err > 0.0, err + 1.0, jnp.exp(err))

    def lovasz_grad(cum_v, gt_v, total_v, bta):
        # Tversky F-score first difference F(i) - F(i-1) computed incrementally:
        # with gt in {0,1}: num_prev = num + c*gt, den_prev = den + (2*gt - 1).
        b2 = bta * bta
        c = 1.0 + b2
        tp = total_v - cum_v               # gt.sum() - cumsum(gt)
        num = tp * c
        den = num + cum_v * b2 + (pos - cum_v)
        num_prev = num + c * gt_v
        den_prev = den + (2.0 * gt_v - 1.0)
        f_term = num * _recip(den)
        # F(-1) := 0  =>  grad(0) = F(0) = 1 - num/den
        fprev_term = jnp.where(pos_i <= 1, 1.0, num_prev * _recip(den_prev))
        return fprev_term - f_term         # == F(i) - F(i-1)

    g = lovasz_grad(cum, gt, total, beta)
    if sym:
        # Flipped problem (-logits, 1-labels, 1/beta) has identical errors, so it
        # shares the sort / err / w:  cum' = pos - cum,  total' = P - total.
        g_b = lovasz_grad(pos - cum, 1.0 - gt,
                          jnp.float32(p_real) - total, 1.0 / beta)
        g = 0.5 * (g + g_b)

    acc = _sum11(jnp.where(valid, g * w, 0.0))         # (1, 1)
    out_ref[...] = jnp.zeros_like(out_ref) + acc       # broadcast into (1, 8, 128)


def _round_up(x, m):
    return ((x + m - 1) // m) * m


def _lovasz_pallas(pred, target, *, beta, per_sample, symmetric):
    pred = jnp.asarray(pred, jnp.float32)
    target = jnp.asarray(target, jnp.float32)
    batch = pred.shape[0]
    if per_sample:
        lg = pred.reshape(batch, -1)
        lb = target.reshape(batch, -1)
    else:
        lg = pred.reshape(1, -1)
        lb = target.reshape(1, -1)
    b_eff, p_real = lg.shape

    signs = 2.0 * lb - 1.0
    errors = 1.0 - lg * signs
    # Single multi-operand sort (key = -errors, payload = bf16 labels) replaces
    # argsort + gathers; the symmetric pass reuses the same sorted stream.
    neg_sorted, gt_sorted = jax.lax.sort((-errors, lb.astype(jnp.bfloat16)),
                                         dimension=1, num_keys=1)
    err_sorted = -neg_sorted
    totals = jnp.sum(lb, axis=1).astype(jnp.int32)                  # (b_eff,)

    rows = _round_up(p_real, 128) // 128
    tile_rows = min(512, _round_up(rows, 16))        # 16: bf16 sublane packing
    rows = _round_up(rows, tile_rows)
    padded = rows * 128
    if padded != p_real:
        pad = padded - p_real
        err_sorted = jnp.pad(err_sorted, ((0, 0), (0, pad)))
        gt_sorted = jnp.pad(gt_sorted, ((0, 0), (0, pad)))
    err3 = err_sorted.reshape(b_eff, rows, 128)                     # f32
    gt3 = gt_sorted.reshape(b_eff, rows, 128)                       # bf16
    n_tiles = rows // tile_rows
    tile_elems = tile_rows * 128

    # Exclusive per-tile prefix of label counts (exact, int32) -> scalar prefetch,
    # which breaks the sequential carry so both grid axes can be "parallel".
    tile_sums = jnp.sum(gt3.astype(jnp.int32).reshape(b_eff, n_tiles, tile_elems),
                        axis=2)
    cum0 = (jnp.cumsum(tile_sums, axis=1) - tile_sums).astype(jnp.int32)
    cum0_flat = cum0.reshape(-1)                                    # (b_eff * n_tiles,)

    # Constant 0/1 matrices (bf16 is exact for them), resident in VMEM.
    i128 = jnp.arange(128)
    tri = (i128[:, None] <= i128[None, :]).astype(jnp.bfloat16)     # (128, 128)
    it = jnp.arange(tile_rows)
    lo = (it[None, :] < it[:, None]).astype(jnp.bfloat16)           # (TR, TR)

    kernel = functools.partial(
        _lovasz_kernel, beta=float(beta), sym=bool(symmetric),
        p_real=int(p_real), tile_rows=int(tile_rows),
        tile_elems=int(tile_elems))

    out = pl.pallas_call(
        kernel,
        out_shape=jax.ShapeDtypeStruct((b_eff, n_tiles * 8, 128), jnp.float32),
        grid_spec=pltpu.PrefetchScalarGridSpec(
            num_scalar_prefetch=2,
            grid=(b_eff, n_tiles),
            in_specs=[
                pl.BlockSpec((1, tile_rows, 128), lambda b, t, tot, c0: (b, t, 0)),
                pl.BlockSpec((1, tile_rows, 128), lambda b, t, tot, c0: (b, t, 0)),
                pl.BlockSpec((128, 128), lambda b, t, tot, c0: (0, 0)),
                pl.BlockSpec((tile_rows, tile_rows), lambda b, t, tot, c0: (0, 0)),
            ],
            out_specs=pl.BlockSpec((1, 8, 128), lambda b, t, tot, c0: (b, t, 0)),
        ),
        compiler_params=pltpu.CompilerParams(
            dimension_semantics=("parallel", "parallel")),
    )(totals, cum0_flat, err3, gt3, tri, lo)

    per_tile = out[:, ::8, 0]                        # (b_eff, n_tiles) partial losses
    return jnp.mean(jnp.sum(per_tile, axis=1))


class LovaszTverskyLoss:
    """JAX/Pallas port of byu.loss.lovasz.LovaszTverskyLoss (forward only)."""

    def __init__(self, beta, per_sample=False, symetric=False):
        self.beta = beta
        self.per_sample = per_sample
        self.symetric = symetric

    def __call__(self, pred, target):
        return _lovasz_pallas(pred, target, beta=self.beta,
                              per_sample=self.per_sample,
                              symmetric=self.symetric)


# ----------------------- pure-JAX reference (torch spec) -----------------------
def _ref_hinge_flat(logits, labels, beta):
    signs = 2.0 * labels - 1.0
    errors = 1.0 - logits * signs
    order = jnp.argsort(-errors)
    errors_sorted = errors[order]
    gt_sorted = labels[order]
    cum = jnp.cumsum(gt_sorted)
    total = jnp.sum(gt_sorted)
    b2 = beta * beta
    tp = total - cum
    fp = jnp.cumsum(1.0 - gt_sorted)
    fn = cum
    fsc = 1.0 - tp * (1.0 + b2) / (tp * (1.0 + b2) + fn * b2 + fp)
    grad = jnp.concatenate([fsc[:1], fsc[1:] - fsc[:-1]])
    w = jnp.where(errors_sorted > 0.0, errors_sorted + 1.0, jnp.exp(errors_sorted))
    return jnp.dot(w, grad)


def _ref_loss(pred, target, beta, per_sample, symetric):
    pred = jnp.asarray(pred, jnp.float32)
    target = jnp.asarray(target, jnp.float32)

    def hinge(lg, lb, bta):
        if per_sample:
            vals = [_ref_hinge_flat(lg[i].reshape(-1), lb[i].reshape(-1), bta)
                    for i in range(lg.shape[0])]
            return sum(vals) / len(vals)
        return _ref_hinge_flat(lg.reshape(-1), lb.reshape(-1), bta)

    if symetric:
        return 0.5 * (hinge(pred, target, beta)
                      + hinge(-pred, 1.0 - target, 1.0 / beta))
    return hinge(pred, target, beta)


if __name__ == "__main__":
    key = jax.random.PRNGKey(0)
    k1, k2 = jax.random.split(key)
    # logits: [B, H, W]; labels: binary masks {0, 1}
    pred = jax.random.normal(k1, (2, 16, 16), dtype=jnp.float32)
    target = (jax.random.uniform(k2, (2, 16, 16)) > 0.5).astype(jnp.float32)

    # plain Lovasz hinge (per-batch)
    loss_fn = LovaszTverskyLoss(beta=1.5, per_sample=False, symetric=False)
    loss = loss_fn(pred, target)
    jax.block_until_ready(loss)

    # symmetric + per-sample variant exercises all code paths
    sym_fn = LovaszTverskyLoss(beta=1.5, per_sample=True, symetric=True)
    loss_sym = sym_fn(pred, target)
    jax.block_until_ready(loss_sym)

    ref = _ref_loss(pred, target, 1.5, False, False)
    ref_sym = _ref_loss(pred, target, 1.5, True, True)
    # slightly loose tolerance to cover the EUP approx-reciprocal (+ Newton step)
    ok = (abs(float(loss) - float(ref)) < 2e-3
          and abs(float(loss_sym) - float(ref_sym)) < 2e-3)
    if not ok:
        raise SystemExit(
            f"MISMATCH: plain {float(loss)} vs {float(ref)}; "
            f"sym {float(loss_sym)} vs {float(ref_sym)}")
    print("KERNEL_OK")
</pallas_src>

<mosaic_0001>
module attributes {stable_mosaic.version = 11 : i64} {
  func.func @_lovasz_kernel(%arg0: i32, %arg1: i32, %arg2: memref<1xi32, #tpu.memory_space<smem>>, %arg3: memref<1xi32, #tpu.memory_space<smem>>, %arg4: memref<1x16x128xf32, #tpu.memory_space<vmem>>, %arg5: memref<1x16x128xbf16, #tpu.memory_space<vmem>>, %arg6: memref<128x128xbf16, #tpu.memory_space<vmem>>, %arg7: memref<16x16xbf16, #tpu.memory_space<vmem>>, %arg8: memref<1x8x128xf32, #tpu.memory_space<vmem>>) attributes {dimension_semantics = [#tpu.dimension_semantics<parallel>, #tpu.dimension_semantics<parallel>], iteration_bounds = array<i64: 1, 1>, scalar_prefetch = 2 : i64, scratch_operands = 0 : i64, tpu.core_type = #tpu.core_type<tc>, window_params = [{transform_indices = @transform_0, window_bounds = array<i64: 1, 16, 128>}, {transform_indices = @transform_1, window_bounds = array<i64: 1, 16, 128>}, {pipeline_mode = #tpu.pipeline_mode<synchronous>, transform_indices = @transform_2, window_bounds = array<i64: 128, 128>}, {pipeline_mode = #tpu.pipeline_mode<synchronous>, transform_indices = @transform_3, window_bounds = array<i64: 16, 16>}, {transform_indices = @transform_4, window_bounds = array<i64: 1, 8, 128>}]} {
    %c0 = arith.constant 0 : index
    %c0_0 = arith.constant 0 : index
    %c0_1 = arith.constant 0 : index
    %0 = vector.load %arg4[%c0, %c0_0, %c0_1] : memref<1x16x128xf32, #tpu.memory_space<vmem>>, vector<1x16x128xf32>
    %1 = vector.shape_cast %0 : vector<1x16x128xf32> to vector<16x128xf32>
    %c0_2 = arith.constant 0 : index
    %c0_3 = arith.constant 0 : index
    %c0_4 = arith.constant 0 : index
    %2 = vector.load %arg5[%c0_2, %c0_3, %c0_4] : memref<1x16x128xbf16, #tpu.memory_space<vmem>>, vector<1x16x128xbf16>
    %3 = vector.shape_cast %2 : vector<1x16x128xbf16> to vector<16x128xbf16>
    %4 = arith.extf %3 : vector<16x128xbf16> to vector<16x128xf32>
    %c0_5 = arith.constant 0 : index
    %c0_6 = arith.constant 0 : index
    %5 = vector.load %arg6[%c0_5, %c0_6] : memref<128x128xbf16, #tpu.memory_space<vmem>>, vector<128x128xbf16>
    %cst = arith.constant dense<0.000000e+00> : vector<16x128xf32>
    %6 = tpu.matmul %3, %5, %cst {dimension_numbers = #tpu.dot_dimension_numbers<[1], [0], [0], [1], [0, 0, 1, 1], [], []>} : vector<16x128xbf16>, vector<128x128xbf16>, vector<16x128xf32> -> vector<16x128xf32>
    %7 = vector.extract_strided_slice %6 {offsets = [0, 127], sizes = [16, 1], strides = [1, 1]} : vector<16x128xf32> to vector<16x1xf32>
    %8 = arith.truncf %7 : vector<16x1xf32> to vector<16x1xbf16>
    %c0_7 = arith.constant 0 : index
    %c0_8 = arith.constant 0 : index
    %9 = vector.load %arg7[%c0_7, %c0_8] : memref<16x16xbf16, #tpu.memory_space<vmem>>, vector<16x16xbf16>
    %10 = vector.shape_cast %8 : vector<16x1xbf16> to vector<16x1xbf16>
    %11 = vector.broadcast %10 : vector<16x1xbf16> to vector<16x128xbf16>
    %cst_9 = arith.constant dense<0.000000e+00> : vector<16x128xf32>
    %12 = tpu.matmul %9, %11, %cst_9 {dimension_numbers = #tpu.dot_dimension_numbers<[1], [0], [0], [1], [0, 0, 1, 1], [], []>} : vector<16x16xbf16>, vector<16x128xbf16>, vector<16x128xf32> -> vector<16x128xf32>
    %c1_i32 = arith.constant 1 : i32
    %13 = arith.muli %arg0, %c1_i32 : i32
    %14 = arith.addi %13, %arg1 : i32
    %15 = arith.index_cast %14 : i32 to index
    %16 = memref.load %arg3[%15] : memref<1xi32, #tpu.memory_space<smem>>
    %17 = arith.sitofp %16 : i32 to f32
    %18 = arith.addf %6, %12 : vector<16x128xf32>
    %19 = vector.broadcast %17 : f32 to vector<16x128xf32>
    %20 = arith.addf %18, %19 : vector<16x128xf32>
    %21 = tpu.iota {dimensions = array<i32: 0>} : vector<16x128xi32>
    %22 = tpu.iota {dimensions = array<i32: 1>} : vector<16x128xi32>
    %c2048_i32 = arith.constant 2048 : i32
    %23 = arith.muli %arg1, %c2048_i32 : i32
    %c128_i32 = arith.constant 128 : i32
    %24 = vector.broadcast %c128_i32 : i32 to vector<16x128xi32>
    %25 = arith.muli %21, %24 : vector<16x128xi32>
    %26 = vector.broadcast %23 : i32 to vector<16x128xi32>
    %27 = arith.addi %26, %25 : vector<16x128xi32>
    %28 = arith.addi %27, %22 : vector<16x128xi32>
    %c1_i32_10 = arith.constant 1 : i32
    %29 = vector.broadcast %c1_i32_10 : i32 to vector<16x128xi32>
    %30 = arith.addi %28, %29 : vector<16x128xi32>
    %31 = arith.sitofp %30 : vector<16x128xi32> to vector<16x128xf32>
    %c512_i32 = arith.constant 512 : i32
    %32 = vector.broadcast %c512_i32 : i32 to vector<16x128xi32>
    %33 = arith.cmpi sle, %30, %32 : vector<16x128xi32>
    %34 = arith.index_cast %arg0 : i32 to index
    %35 = memref.load %arg2[%34] : memref<1xi32, #tpu.memory_space<smem>>
    %36 = arith.sitofp %35 : i32 to f32
    %cst_11 = arith.constant 0.000000e+00 : f32
    %37 = vector.broadcast %cst_11 : f32 to vector<16x128xf32>
    %38 = arith.cmpf ogt, %1, %37 : vector<16x128xf32>
    %cst_12 = arith.constant 1.000000e+00 : f32
    %39 = vector.broadcast %cst_12 : f32 to vector<16x128xf32>
    %40 = arith.addf %1, %39 : vector<16x128xf32>
    %41 = math.exp %1 : vector<16x128xf32>
    %42 = arith.select %38, %40, %41 : vector<16x128xi1>, vector<16x128xf32>
    %43 = vector.broadcast %36 : f32 to vector<16x128xf32>
    %44 = arith.subf %43, %20 : vector<16x128xf32>
    %cst_13 = arith.constant 3.250000e+00 : f32
    %45 = vector.broadcast %cst_13 : f32 to vector<16x128xf32>
    %46 = arith.mulf %44, %45 : vector<16x128xf32>
    %cst_14 = arith.constant 2.250000e+00 : f32
    %47 = vector.broadcast %cst_14 : f32 to vector<16x128xf32>
    %48 = arith.mulf %20, %47 : vector<16x128xf32>
    %49 = arith.addf %46, %48 : vector<16x128xf32>
    %50 = arith.subf %31, %20 : vector<16x128xf32>
    %51 = arith.addf %49, %50 : vector<16x128xf32>
    %cst_15 = arith.constant 3.250000e+00 : f32
    %52 = vector.broadcast %cst_15 : f32 to vector<16x128xf32>
    %53 = arith.mulf %52, %4 : vector<16x128xf32>
    %54 = arith.addf %46, %53 : vector<16x128xf32>
    %cst_16 = arith.constant 2.000000e+00 : f32
    %55 = vector.broadcast %cst_16 : f32 to vector<16x128xf32>
    %56 = arith.mulf %55, %4 : vector<16x128xf32>
    %cst_17 = arith.constant 1.000000e+00 : f32
    %57 = vector.broadcast %cst_17 : f32 to vector<16x128xf32>
    %58 = arith.subf %56, %57 : vector<16x128xf32>
    %59 = arith.addf %51, %58 : vector<16x128xf32>
    %60 = tpu.reciprocal %51 {approx = true} : vector<16x128xf32> -> vector<16x128xf32>
    %61 = arith.mulf %51, %60 : vector<16x128xf32>
    %cst_18 = arith.constant 2.000000e+00 : f32
    %62 = vector.broadcast %cst_18 : f32 to vector<16x128xf32>
    %63 = arith.subf %62, %61 : vector<16x128xf32>
    %64 = arith.mulf %60, %63 : vector<16x128xf32>
    %65 = arith.mulf %46, %64 : vector<16x128xf32>
    %c1_i32_19 = arith.constant 1 : i32
    %66 = vector.broadcast %c1_i32_19 : i32 to vector<16x128xi32>
    %67 = arith.cmpi sle, %30, %66 : vector<16x128xi32>
    %68 = tpu.reciprocal %59 {approx = true} : vector<16x128xf32> -> vector<16x128xf32>
    %69 = arith.mulf %59, %68 : vector<16x128xf32>
    %cst_20 = arith.constant 2.000000e+00 : f32
    %70 = vector.broadcast %cst_20 : f32 to vector<16x128xf32>
    %71 = arith.subf %70, %69 : vector<16x128xf32>
    %72 = arith.mulf %68, %71 : vector<16x128xf32>
    %73 = arith.mulf %54, %72 : vector<16x128xf32>
    %cst_21 = arith.constant 1.000000e+00 : f32
    %74 = vector.broadcast %cst_21 : f32 to vector<16x128xf32>
    %75 = arith.select %67, %74, %73 : vector<16x128xi1>, vector<16x128xf32>
    %76 = arith.subf %75, %65 : vector<16x128xf32>
    %77 = arith.mulf %76, %42 : vector<16x128xf32>
    %cst_22 = arith.constant 0.000000e+00 : f32
    %78 = vector.broadcast %cst_22 : f32 to vector<16x128xf32>
    %79 = arith.select %33, %77, %78 : vector<16x128xi1>, vector<16x128xf32>
    %cst_23 = arith.constant dense<0.000000e+00> : vector<16xf32>
    %80 = vector.multi_reduction <add>, %79, %cst_23 [1] : vector<16x128xf32> to vector<16xf32>
    %81 = vector.shape_cast %80 : vector<16xf32> to vector<16x1xf32>
    %cst_24 = arith.constant dense<0.000000e+00> : vector<1xf32>
    %82 = vector.multi_reduction <add>, %81, %cst_24 [0] : vector<16x1xf32> to vector<1xf32>
    %83 = vector.shape_cast %82 : vector<1xf32> to vector<1x1xf32>
    %cst_25 = arith.constant 0.000000e+00 : f32
    %84 = vector.broadcast %cst_25 : f32 to vector<1x8x128xf32>
    %85 = vector.shape_cast %83 : vector<1x1xf32> to vector<1x1x1xf32>
    %86 = vector.broadcast %85 : vector<1x1x1xf32> to vector<1x8x128xf32>
    %87 = arith.addf %84, %86 : vector<1x8x128xf32>
    %c0_26 = arith.constant 0 : index
    %c0_27 = arith.constant 0 : index
    %c0_28 = arith.constant 0 : index
    %88 = vector.load %arg8[%c0_26, %c0_27, %c0_28] : memref<1x8x128xf32, #tpu.memory_space<vmem>>, vector<1x8x128xf32>
    tpu.vector_store %arg8[%c0_26, %c0_27, %c0_28], %87 {strides = array<i32>} : memref<1x8x128xf32, #tpu.memory_space<vmem>>, vector<1x8x128xf32>,
    return
  }
  func.func @transform_0(%arg0: i32, %arg1: i32, %arg2: memref<1xi32, #tpu.memory_space<smem>>, %arg3: memref<1xi32, #tpu.memory_space<smem>>) -> (i32, i32, i32) {
    %c0_i32 = arith.constant 0 : i32
    %c0_i32_0 = arith.constant 0 : i32
    return %arg0, %arg1, %c0_i32 : i32, i32, i32
  }
  func.func @transform_1(%arg0: i32, %arg1: i32, %arg2: memref<1xi32, #tpu.memory_space<smem>>, %arg3: memref<1xi32, #tpu.memory_space<smem>>) -> (i32, i32, i32) {
    %c0_i32 = arith.constant 0 : i32
    %c0_i32_0 = arith.constant 0 : i32
    return %arg0, %arg1, %c0_i32 : i32, i32, i32
  }
  func.func @transform_2(%arg0: i32, %arg1: i32, %arg2: memref<1xi32, #tpu.memory_space<smem>>, %arg3: memref<1xi32, #tpu.memory_space<smem>>) -> (i32, i32) {
    %c0_i32 = arith.constant 0 : i32
    %c0_i32_0 = arith.constant 0 : i32
    %c0_i32_1 = arith.constant 0 : i32
    return %c0_i32, %c0_i32_0 : i32, i32
  }
  func.func @transform_3(%arg0: i32, %arg1: i32, %arg2: memref<1xi32, #tpu.memory_space<smem>>, %arg3: memref<1xi32, #tpu.memory_space<smem>>) -> (i32, i32) {
    %c0_i32 = arith.constant 0 : i32
    %c0_i32_0 = arith.constant 0 : i32
    %c0_i32_1 = arith.constant 0 : i32
    return %c0_i32, %c0_i32_0 : i32, i32
  }
  func.func @transform_4(%arg0: i32, %arg1: i32, %arg2: memref<1xi32, #tpu.memory_space<smem>>, %arg3: memref<1xi32, #tpu.memory_space<smem>>) -> (i32, i32, i32) {
    %c0_i32 = arith.constant 0 : i32
    %c0_i32_0 = arith.constant 0 : i32
    return %arg0, %arg1, %c0_i32 : i32, i32, i32
  }
}

</mosaic_0001>

<bundles_post_ra>
// kernel: tpu_custom_call.1
= control target key start
LH: loop header
LB: loop body
LE: loop exit
PB: predicated region body
PF: predicated region fallthrough
CT: control target
= control target key end

     0   :  { %13 = vsyncpa [#allocation6], 0  ;;  %s633_s0 = inlined_call_operand.<no memory space> [shape: s32[1], index: 0, kind: input, shape index: {}]   ;;  %s634_s1 = inlined_call_operand.<no memory space> [shape: s32[1], index: 1, kind: input, shape index: {}]   ;;  %s635_s2 = inlined_call_operand.hbm [shape: f32[1,16,128], index: 2, kind: input, shape index: {}]   ;;  %s636_s3 = inlined_call_operand.hbm [shape: bf16[1,16,128], index: 3, kind: input, shape index: {}]   ;;  %s637_s4 = inlined_call_operand.hbm [shape: bf16[128,128], index: 4, kind: input, shape index: {}]   ;;  %s638_s5 = inlined_call_operand.hbm [shape: bf16[16,16], index: 5, kind: input, shape index: {}]   ;;  %s639_s6 = inlined_call_operand.hbm [shape: f32[1,8,128], index: 6, kind: output, shape index: {}]  }
   0x1   :  { %14 = vsyncpa [#allocation9], 0 }
   0x2   :  { %15 = vsyncpa [#allocation12], 0  ;;  %s34_s23 = sshll.u32 %s636_s3, 4  ;;  %s35_s23 = int_to_ptr.hbm [resolvable:$true] %s34_s23 }
   0x3   :  { %16 = vsyncpa [#allocation7], 0  ;;  %s556_s24 = smov [#allocation8]   ;;  %s21_s28 = sshll.u32 %s635_s2, 4  ;;  %s22_s28 = int_to_ptr.hbm [resolvable:$true] %s21_s28 }
   0x4   :  { %s36_s25 = sshll.u32 %s556_s24, 4  ;;  %s557_s29 = smov 64   ;;  %s37_s25 = int_to_ptr.vmem [resolvable:$true] %s36_s25 }
   0x5   :  { %s558_s30 = smov 4   ;;  %s559_s7 = smov [#allocation5]  }
   0x6   :  { %42 = dma.hbm_to_vmem [thread:$0]  %s35_s23, 128, %s37_s25, [#allocation9], %s557_s29, %s557_s29, %s558_s30  }
   0x7   :  { %s23_s8 = sshll.u32 %s559_s7, 4  ;;  %s560_s9 = smov 128   ;;  %s24_s8 = int_to_ptr.vmem [resolvable:$true] %s23_s8 }
   0x8   :  { %s561_s10 = smov 8   ;;  %s47_s12 = sshll.u32 %s637_s4, 4  ;;  %s48_s12 = int_to_ptr.hbm [resolvable:$true] %s47_s12 }
   0x9   :  { %29 = dma.hbm_to_vmem [thread:$0]  %s22_s28, 256, %s24_s8, [#allocation6], %s560_s9, %s560_s9, %s561_s10  }
   0xa   :  { %s562_s13 = smov [#allocation10]   ;;  %s60_s16 = sshll.u32 %s638_s5, 4  ;;  %s61_s16 = int_to_ptr.hbm [resolvable:$true] %s60_s16 }
   0xb   :  { %s49_s14 = sshll.u32 %s562_s13, 4  ;;  %s563_s17 = smov [#allocation11]   ;;  %s50_s14 = int_to_ptr.vmem [resolvable:$true] %s49_s14 }
   0xc   :  { %55 = dma.hbm_to_vmem [thread:$0]  %s48_s12, 1024, %s50_s14, [#allocation9], %s557_s29, %s557_s29, %s558_s30  }
   0xd   :  { %s62_s18 = sshll.u32 %s563_s17, 4  ;;  %s63_s18 = int_to_ptr.vmem [resolvable:$true] %s62_s18 }
   0xe   :  { %68 = dma.hbm_to_vmem [thread:$0]  %s61_s16, 128, %s63_s18, [#allocation12], %s557_s29, %s557_s29, %s558_s30  }
   0xf   :  { %548 = dma.done.wait [#allocation6], 256  }
  0x10   :  { %549 = vsyncadd [#allocation6], 4294967040 }
  0x11   :  { %550 = dma.done.wait [#allocation9], 1152  }
  0x12   :  { %551 = vsyncadd [#allocation9], 4294966144 }
  0x13   :  { %552 = dma.done.wait [#allocation12], 128  }
  0x14   :  { %553 = vsyncadd [#allocation12], 4294967168  ;;  %v402_v0 = vld [vmem:[#allocation10 + $0x38] sm:$0xff]  ;;  %v401_v1 = vld [vmem:[#allocation10 + $0x30] sm:$0xff]  ;;  %v564_v9 = vmov 127   ;;  %vm209_vm0 = vcmask 130048   ;;  %v235_v25 = vlaneseq  ;;  %s229_s19 = scvt.s32.f32 %s634_s1  ;;  %s255_s22 = scvt.s32.f32 %s633_s0 }
  0x15   :  { %162 = vmatpush.bf16.msra.mxu0 %v402_v0  ;;  %v400_v2 = vld [vmem:[#allocation10 + $0x28] sm:$0xff]  ;;  %v399_v3 = vld [vmem:[#allocation10 + $0x20] sm:$0xff]  ;;  %v398_v4 = vld [vmem:[#allocation10 + $0x18] sm:$0xff]  ;;  %415 = vset.pattern.permute.xlu0 %v564_v9  ;;  %v565_v14 = vmov 839922192   ;;  %s566_s0 = smov [#allocation13]  }
  0x16   :  { %v397_v5 = vld [vmem:[#allocation10 + $0x10] sm:$0xff]  ;;  %v396_v6 = vld [vmem:[#allocation10 + $0x8] sm:$0xff]  ;;  %v395_v7 = vld [vmem:[#allocation10] sm:$0xff]  ;;  %v186_v15 = vunpack.c.l.s4 %v565_v14  ;;  %v236_v26 = vshrl.u32 %v235_v25, 7  ;;  %v239_v27 = vand.u32 127, %v235_v25  ;;  %v232_v32 = vstv %s229_s19  ;;  %s337_s1 = sshll.u32 %s566_s0, 4  ;;  %s338_s1 = int_to_ptr.vmem [resolvable:$true] %s337_s1 }
  0x17   :  { %v394_v8 = vld [vmem:[#allocation8] sm:$0xff]  ;;  %v403_v24 = vld [vmem:[#allocation11] sm:$0xff]  ;;  %v266_v37 = vstv %s255_s22  ;;  %v86_v57 = vld [vmem:[#allocation5] sm:$0xff]  ;;  %s339_s25 = sshll.u32 %s639_s6, 4  ;;  %s340_s25 = int_to_ptr.hbm [resolvable:$true] %s339_s25 }
  0x18   :  { %v187_v17 = vunpack.c.0.s8 %v186_v15  ;;  %v241_v28 = vmul.u32 128, %v236_v26  ;;  %v237_v29 = vadd.s32 8, %v236_v26  ;;  %v88_v33 = vld [vmem:[#allocation8] sm:$0xff]   ;;  %v260_v62 = vmul.f32 1.442695, %v86_v57 }
  0x19   :  { %163 = vmatpush.bf16.msra.mxu0 %v401_v1  ;;  %v90_v39 = vunpack.c.l.bf16 %v88_v33  ;;  %v91_v54 = vunpack.c.h.bf16 %v88_v33  ;;  %v258_v15 = vadd.f32 1.0, %v86_v57  ;;  %vm256_vm1 = vcmp.gt.f32.partialorder %v86_v57, 0.0 }
  0x1a   :  { %v246_v30 = vadd.s32 %v241_v28, %v239_v27  ;;  %v242_v34 = vmul.u32 128, %v237_v29 }
  0x1b   :  { %v283_v43 = vmul.f32 2.0, %v90_v39  ;;  %v284_v59 = vmul.f32 2.0, %v91_v54 }
  0x1c   :  { %v620_v36 = vadd.s32 1, %v246_v30  ;;  %v247_v40 = vadd.s32 %v242_v34, %v239_v27 }
  0x1d   :  { %164 = vmatpush.bf16.msra.mxu0 %v400_v2  ;;  %v392_v51 = vadd.f32 -1.0, %v283_v43  ;;  %v393_v1 = vadd.f32 -1.0, %v284_v59 }
  0x1e   :  { %v250_v42 = vcvt.s32.f32 %v620_v36  ;;  %v623_v47 = vadd.s32 1, %v247_v40  ;;  %vm299_vm2 = vcmp.le.s32.totalorder %v620_v36, 1  ;;  %vm252_vm3 = vcmp.le.s32.totalorder %v620_v36, 512 }
  0x20   :  { %v251_v55 = vcvt.s32.f32 %v623_v47  ;;  %vm300_vm5 = vcmp.le.s32.totalorder %v623_v47, 1  ;;  %vm253_vm6 = vcmp.le.s32.totalorder %v623_v47, 512 }
  0x21   :  { %165 = vmatpush.bf16.msra.mxu0 %v399_v3 }
  0x25   :  { %166 = vmatpush.bf16.msra.mxu0 %v398_v4 }
  0x29   :  { %167 = vmatpush.bf16.msra.mxu0 %v397_v5 }
  0x2d   :  { %168 = vmatpush.bf16.msra.mxu0 %v396_v6 }
  0x31   :  { %169 = vmatpush.bf16.msra.mxu0 %v395_v7  ;;  %v279_v7 = vmul.f32 3.25, %v90_v39 }
  0x34   :  { %170 = vmatmul.bf16.vlgmr.msra.gmra.mxu0 %v394_v8 }
  0xb1   :  { %v171_v10 = vpop.f32.mrf.mxu0 }
  0xb2   :  { %v176_v11 = vpack.c.bf16 %v171_v10, %v171_v10 }
  0xb4   :  { %182 = vperm.xlu0 %415, %v176_v11  }
  0xb9   :  { %v173_v12 = vpop.f32.mrf.mxu0 }
  0xba   :  { %v177_v13 = vpack.c.bf16 %v173_v12, %v173_v12 }
  0xbc   :  { %191 = vperm.xlu0 %415, %v177_v13  }
 0x126   :  { %v183_v16 = vpop.permute.xlu0 %182 }
 0x127   :  { %v188_v18 = vperm.slane %v183_v16, %v187_v17 }
 0x129   :  { %v205_v21 = vunpack.c.l.b16 %v188_v18 }
 0x12e   :  { %v192_v19 = vpop.permute.xlu0 %191 }
 0x12f   :  { %v197_v20 = vperm.slane %v192_v19, %v187_v17 }
 0x131   :  { %v206_v22 = vunpack.c.l.b16 %v197_v20 }
 0x133   :  { %v207_v23 = vpack.c.b16 %v206_v22, %v205_v21 }
 0x135   :  { %220 = vmatpush.bf16.msra.mxu1 %v207_v23  ;;  %v280_v23 = vmul.f32 3.25, %v91_v54 }
 0x138   :  { %391 = vmatmul.msk.bf16.vlgmr.msra.gmra.mxu1 %vm209_vm0, %v403_v24 }
 0x1b5   :  { %v222_v31 = vpop.f32.mrf.mxu1 }
 0x1b6   :  { %v230_v35 = vadd.f32 %v222_v31, %v171_v10  ;;  %v87_v10 = vld [vmem:[#allocation5 + $0x8] sm:$0xff] }
 0x1b7   :  { %v262_v13 = vmul.f32 1.442695, %v87_v10  ;;  %vm257_vm4 = vcmp.gt.f32.partialorder %v87_v10, 0.0 }
 0x1b8   :  { %v233_v38 = vadd.f32 %v232_v32, %v230_v35 }
 0x1ba   :  { %v267_v41 = vsub.f32 %v266_v37, %v233_v38  ;;  %v271_v45 = vmul.f32 2.25, %v233_v38  ;;  %v275_v50 = vsub.f32 %v250_v42, %v233_v38 }
 0x1bc   :  { %v269_v44 = vmul.f32 3.25, %v267_v41 }
 0x1bd   :  { %v224_v46 = vpop.f32.mrf.mxu1 }
 0x1be   :  { %v273_v48 = vadd.f32 %v271_v45, %v269_v44  ;;  %v231_v49 = vadd.f32 %v224_v46, %v173_v12  ;;  %v281_v16 = vadd.f32 %v279_v7, %v269_v44 }
 0x1c0   :  { %v234_v52 = vadd.f32 %v232_v32, %v231_v49  ;;  %v277_v53 = vadd.f32 %v275_v50, %v273_v48  ;;  %v259_v32 = vadd.f32 1.0, %v87_v10 }
 0x1c2   :  { %v268_v56 = vsub.f32 %v266_v37, %v234_v52  ;;  %v287_v58 = vadd.f32 %v392_v51, %v277_v53  ;;  %416 = vrcp.f32 %v277_v53  ;;  %v272_v61 = vmul.f32 2.25, %v234_v52 }
 0x1c3   :  { %v276_v0 = vsub.f32 %v251_v55, %v234_v52 }
 0x1c4   :  { %v270_v60 = vmul.f32 3.25, %v268_v56  ;;  %418 = vrcp.f32 %v287_v58 }
 0x1c5   :  { %420 = vpow2.f32 %v260_v62 }
 0x1c6   :  { %v274_v63 = vadd.f32 %v272_v61, %v270_v60  ;;  %v282_v33 = vadd.f32 %v280_v23, %v270_v60 }
 0x1c8   :  { %v417_v2 = vpop.eup %416  ;;  %v278_v3 = vadd.f32 %v276_v0, %v274_v63 }
 0x1c9   :  { %v291_v4 = vmul.f32 %v417_v2, %v277_v53 }
 0x1ca   :  { %v419_v5 = vpop.eup %418  ;;  %v288_v6 = vadd.f32 %v393_v1, %v278_v3  ;;  %422 = vrcp.f32 %v278_v3 }
 0x1cb   :  { %v293_v8 = vsub.f32 2.0, %v291_v4  ;;  %v303_v9 = vmul.f32 %v419_v5, %v287_v58  ;;  %v421_v14 = vpop.eup %420 }
 0x1cc   :  { %424 = vrcp.f32 %v288_v6  ;;  %v264_v24 = vsel %vm256_vm1, %v258_v15, %v421_v14 }
 0x1cd   :  { %v305_v11 = vsub.f32 2.0, %v303_v9  ;;  %v295_v12 = vmul.f32 %v417_v2, %v293_v8  ;;  %426 = vpow2.f32 %v262_v13 }
 0x1cf   :  { %v307_v17 = vmul.f32 %v419_v5, %v305_v11  ;;  %v297_v22 = vmul.f32 %v295_v12, %v269_v44 }
 0x1d0   :  { %v423_v18 = vpop.eup %422 }
 0x1d1   :  { %v309_v19 = vmul.f32 %v307_v17, %v281_v16  ;;  %v292_v20 = vmul.f32 %v423_v18, %v278_v3 }
 0x1d2   :  { %v425_v21 = vpop.eup %424 }
 0x1d3   :  { %v311_v25 = vsel %vm299_vm2, 1.0, %v309_v19  ;;  %v294_v26 = vsub.f32 2.0, %v292_v20  ;;  %v304_v27 = vmul.f32 %v425_v21, %v288_v6  ;;  %v427_v35 = vpop.eup %426 }
 0x1d4   :  { %v313_v28 = vsub.f32 %v311_v25, %v297_v22  ;;  %v265_v40 = vsel %vm257_vm4, %v259_v32, %v427_v35 }
 0x1d5   :  { %v306_v29 = vsub.f32 2.0, %v304_v27  ;;  %v296_v31 = vmul.f32 %v423_v18, %v294_v26 }
 0x1d6   :  { %v315_v30 = vmul.f32 %v313_v28, %v264_v24 }
 0x1d7   :  { %v308_v34 = vmul.f32 %v425_v21, %v306_v29  ;;  %v298_v39 = vmul.f32 %v296_v31, %v270_v60 }
 0x1d8   :  { %v317_v37 = vsel %vm252_vm3, %v315_v30, 0.0 }
 0x1d9   :  { %319 = vadd.xlane.f32.xlu1 %v317_v37  ;;  %v310_v38 = vmul.f32 %v308_v34, %v282_v33 }
 0x1db   :  { %v312_v41 = vsel %vm300_vm5, 1.0, %v310_v38 }
 0x1dc   :  { %v314_v42 = vsub.f32 %v312_v41, %v298_v39 }
 0x1de   :  { %v316_v36 = vmul.f32 %v314_v42, %v265_v40 }
 0x1e0   :  { %v318_v43 = vsel %vm253_vm6, %v316_v36, 0.0 }
 0x1e1   :  { %321 = vadd.xlane.f32.xlu1 %v318_v43 }
 0x24c   :  { %v320_v44 = vpop.xlane.xlu1 %319 }
 0x254   :  { %v322_v45 = vpop.xlane.xlu1 %321 }
 0x255   :  { %v323_v46 = vadd.f32 %v322_v45, %v320_v44 }
 0x257   :  { %v324_v48 = vrot.slane %v323_v46, 4 }
 0x259   :  { %v325_v49 = vadd.f32 %v324_v48, %v323_v46 }
 0x25b   :  { %v326_v50 = vrot.slane %v325_v49, 2 }
 0x25d   :  { %v327_v51 = vadd.f32 %v326_v50, %v325_v49 }
 0x25f   :  { %v328_v52 = vrot.slane %v327_v51, 1 }
 0x261   :  { %v329_v53 = vadd.f32 %v328_v52, %v327_v51 }
 0x263   :  { %331 = vst [vmem:[#allocation13] sm:$0xff] %v329_v53 }
 0x264   :  { %342 = dma.vmem_to_hbm [thread:$0]  %s338_s1, 128, %s340_s25, [#allocation7]  }
 0x265   :  { %554 = dma.done.wait [#allocation7], 128  }
 0x266   :  { %555 = vsyncadd [#allocation7], 4294967168 }
 0x267   :  { %347 = vsyncpa [#allocation6], 1 }
 0x268   :  { %348 = vsyncpa [#allocation9], 1 }
 0x269   :  { %349 = vsyncpa [#allocation12], 1 }
 0x26a   :  { %350 = vsyncpa [#allocation7], 1 }

</bundles_post_ra>
